<compile_context>
chip_gen: v7x
topology: tpu7x:2x2x1
jax: 0.10.0
libtpu: 0.0.40
codegen_flags: <defaults>
</compile_context>

<pallas_src>
import functools

import jax
import jax.numpy as jnp
from jax.experimental import pallas as pl
from jax.experimental.pallas import tpu as pltpu


def _round_up(x, m):
    return (x + m - 1) // m * m


def _vmem_params():
    """(tile budget, vmem_limit_bytes), derived from the chip's VMEM size."""
    try:
        cap = int(pltpu.get_tpu_info().vmem_capacity_bytes)
    except Exception:  # pragma: no cover - conservative fallback (v7x per-core)
        cap = 64 * 1024 * 1024
    tile_budget = min((cap * 13) // 20, 96 * 1024 * 1024)   # ~65% for our blocks
    vmem_limit = min((cap * 9) // 10, 112 * 1024 * 1024)    # headroom for Mosaic
    return tile_budget, vmem_limit


def _choose_tiles(Mp, Kp, itemsize, tile_budget):
    """Largest (tm, tk) whose working set fits the per-kernel VMEM budget.

    Working set (worst case over both kernel variants):
      rhs features (Mp, tk) double-buffered
      lhs features (tm, tk) double-buffered
      (tm, Mp) f32 target (double-buffered) + (tm, Mp) f32 accumulator
    Arithmetic intensity grows with tm, so tm is preferred over tk.
    """
    tm_cands = [t for t in (1024, 512, 256, 128) if t <= Mp and Mp % t == 0]
    tk_cands = [t for t in (2048, 1024, 512, 256, 128) if t <= Kp and Kp % t == 0]

    def need(tm, tk):
        return (2 * Mp * tk * itemsize        # rhs features (all rows), x2 buffers
                + 2 * tm * tk * itemsize      # lhs features row block, x2 buffers
                + 3 * tm * Mp * 4)            # target (x2) + f32 accumulator (x1)

    for tm in tm_cands:
        for tk in tk_cands:
            if need(tm, tk) <= tile_budget:
                return tm, tk
    return tm_cands[-1], tk_cands[-1]


def _gram_kernel(lhs_ref, rhs_ref, gram_ref, *, inv_div):
    """grid = (gram row blocks [parallel], K blocks [arbitrary]).

    lhs_ref:  (tm, tk)  row block of the padded features
    rhs_ref:  (Mp, tk)  K-slice of the padded features (all rows)
    gram_ref: (tm, Mp)  f32 output row block, resident across K
    """
    k = pl.program_id(1)

    @pl.when(k == 0)
    def _():
        gram_ref[...] = jnp.zeros_like(gram_ref)

    gram_ref[...] += jax.lax.dot_general(
        lhs_ref[...], rhs_ref[...],
        dimension_numbers=(((1,), (1,)), ((), ())),
        preferred_element_type=jnp.float32)

    @pl.when(k == pl.num_programs(1) - 1)
    def _():
        gram_ref[...] = gram_ref[...] * inv_div


def _loss_kernel(lhs_ref, rhs_ref, target_ref, psum_ref, acc_ref, *, inv_div):
    """Loss-only path: the gram row block never leaves VMEM.

    lhs_ref:    (tm, tk)  row block of the padded features
    rhs_ref:    (Mp, tk)  K-slice of the padded features (all rows)
    target_ref: (tm, Mp)  f32 row block of the padded target gram
    psum_ref:   (1, 1)    SMEM partial sum of squared error for this row block
    acc_ref:    (tm, Mp)  f32 VMEM scratch accumulator
    """
    k = pl.program_id(1)

    @pl.when(k == 0)
    def _():
        acc_ref[...] = jnp.zeros_like(acc_ref)
        psum_ref[0, 0] = jnp.float32(0.0)

    acc_ref[...] += jax.lax.dot_general(
        lhs_ref[...], rhs_ref[...],
        dimension_numbers=(((1,), (1,)), ((), ())),
        preferred_element_type=jnp.float32)

    @pl.when(k == pl.num_programs(1) - 1)
    def _():
        diff = acc_ref[...] * inv_div - target_ref[...]
        psum_ref[0, 0] = jnp.sum(diff * diff)


def _pad_features(x, compute_dtype):
    B, H, W, C = x.shape
    M, K = B * H, W * C
    Mp, Kp = _round_up(M, 128), _round_up(K, 128)
    f = x.reshape(M, K).astype(compute_dtype)
    if (Mp, Kp) != (M, K):
        f = jnp.pad(f, ((0, Mp - M), (0, Kp - K)))
    return f, M, K, Mp, Kp


@functools.partial(jax.jit, static_argnames=("compute_dtype",))
def gram_matrix_padded(feature, compute_dtype=jnp.bfloat16):
    """Padded (Mp, Mp) f32 gram of `feature`; the pad region is exactly zero.

    gram[:M, :M] matches the PyTorch gram_matrix up to the bf16 MXU
    quantization (pass compute_dtype=jnp.float32 for exact f32 numerics).
    """
    f, M, K, Mp, Kp = _pad_features(feature, compute_dtype)
    itemsize = jnp.dtype(compute_dtype).itemsize
    tile_budget, vmem_limit = _vmem_params()
    tm, tk = _choose_tiles(Mp, Kp, itemsize, tile_budget)
    inv_div = 1.0 / float(M * K)

    kernel = functools.partial(_gram_kernel, inv_div=inv_div)
    return pl.pallas_call(
        kernel,
        out_shape=jax.ShapeDtypeStruct((Mp, Mp), jnp.float32),
        grid_spec=pltpu.PrefetchScalarGridSpec(
            num_scalar_prefetch=0,
            grid=(Mp // tm, Kp // tk),
            in_specs=[
                pl.BlockSpec((tm, tk), lambda i, k: (i, k)),   # lhs row block
                pl.BlockSpec((Mp, tk), lambda i, k: (0, k)),   # rhs, all rows
            ],
            out_specs=pl.BlockSpec((tm, Mp), lambda i, k: (i, 0)),
        ),
        compiler_params=pltpu.CompilerParams(
            dimension_semantics=("parallel", "arbitrary"),
            vmem_limit_bytes=vmem_limit,
        ),
    )(f, f)


@functools.partial(jax.jit, static_argnames=("compute_dtype",))
def style_mse_loss(style, target_gram_padded, compute_dtype=jnp.bfloat16):
    """mean((gram_matrix(style) - target)^2); the style gram never hits HBM."""
    f, M, K, Mp, Kp = _pad_features(style, compute_dtype)
    itemsize = jnp.dtype(compute_dtype).itemsize
    tile_budget, vmem_limit = _vmem_params()
    tm, tk = _choose_tiles(Mp, Kp, itemsize, tile_budget)
    inv_div = 1.0 / float(M * K)
    n_row_blocks = Mp // tm

    kernel = functools.partial(_loss_kernel, inv_div=inv_div)
    psums = pl.pallas_call(
        kernel,
        out_shape=jax.ShapeDtypeStruct((n_row_blocks, 1), jnp.float32),
        grid_spec=pltpu.PrefetchScalarGridSpec(
            num_scalar_prefetch=0,
            grid=(n_row_blocks, Kp // tk),
            in_specs=[
                pl.BlockSpec((tm, tk), lambda i, k: (i, k)),   # lhs row block
                pl.BlockSpec((Mp, tk), lambda i, k: (0, k)),   # rhs, all rows
                pl.BlockSpec((tm, Mp), lambda i, k: (i, 0)),   # target gram rows
            ],
            out_specs=pl.BlockSpec((1, 1), lambda i, k: (i, 0),
                                   memory_space=pltpu.SMEM),
            scratch_shapes=[pltpu.VMEM((tm, Mp), jnp.float32)],
        ),
        compiler_params=pltpu.CompilerParams(
            dimension_semantics=("parallel", "arbitrary"),
            vmem_limit_bytes=vmem_limit,
        ),
    )(f, f, target_gram_padded)

    return jnp.sum(psums) * (1.0 / float(M * M))


class StyleLoss:
    """JAX/Pallas analogue of the PyTorch StyleLoss module.

    Gram matmuls run on the MXU in bf16 with f32 accumulation by default;
    pass compute_dtype=jnp.float32 for exact f32 numerics.
    """

    def __init__(self, target_feature, compute_dtype=jnp.bfloat16):
        B, H, W, C = target_feature.shape
        M = B * H
        self._compute_dtype = compute_dtype
        # Target gram computed once, kept padded (pad region is exactly zero)
        # so forward() never re-pads / re-casts it.
        self._target_padded = jax.block_until_ready(
            gram_matrix_padded(target_feature, compute_dtype=compute_dtype))
        self.target = self._target_padded[:M, :M]
        # mse(target, target) == 0 exactly -> skip the redundant launch.
        self.loss = jnp.float32(0.0)

    def forward(self, style):
        self.loss = style_mse_loss(style, self._target_padded,
                                   compute_dtype=self._compute_dtype)
        return style

    __call__ = forward


if __name__ == "__main__":
    key = jax.random.PRNGKey(0)
    k1, k2 = jax.random.split(key)

    # Small shapes consistent with gram_matrix's (B, H, W, C) convention.
    B, H, W, C = 2, 16, 16, 16      # M = B*H = 32, K = W*C = 256

    target_feature = jax.random.normal(k1, (B, H, W, C), dtype=jnp.float32)
    style = jax.random.normal(k2, (B, H, W, C), dtype=jnp.float32)

    module = StyleLoss(target_feature)
    out = module(style)
    out = jax.block_until_ready(out)
    loss = float(jax.block_until_ready(module.loss))

    # --- sanity checks ---------------------------------------------------
    def ref_gram(x):
        b, h, w, c = x.shape
        f = x.reshape(b * h, w * c)
        return (f @ f.T) / (b * h * w * c)

    # Kernel target gram vs. exact f32 reference (loose: bf16 MXU inputs).
    assert jnp.allclose(module.target, ref_gram(target_feature),
                        rtol=1e-2, atol=5e-4)

    # Loss vs. the exact f32 reference.
    ref_loss = float(jnp.mean(
        (ref_gram(style) - ref_gram(target_feature)) ** 2))
    assert abs(loss - ref_loss) <= 5e-2 * abs(ref_loss) + 1e-8, (loss, ref_loss)

    # forward() returns its input unchanged.
    assert jnp.array_equal(out, style)

    print("KERNEL_OK")
</pallas_src>

<mosaic_0001>
module attributes {stable_mosaic.version = 11 : i64} {
  func.func @_gram_kernel(%arg0: i32, %arg1: i32, %arg2: memref<128x256xbf16, #tpu.memory_space<vmem>>, %arg3: memref<128x256xbf16, #tpu.memory_space<vmem>>, %arg4: memref<128x128xf32, #tpu.memory_space<vmem>>) attributes {dimension_semantics = [#tpu.dimension_semantics<parallel>, #tpu.dimension_semantics<arbitrary>], iteration_bounds = array<i64: 1, 1>, scalar_prefetch = 0 : i64, scratch_operands = 0 : i64, tpu.core_type = #tpu.core_type<tc>, window_params = [{transform_indices = @transform_0, window_bounds = array<i64: 128, 256>}, {transform_indices = @transform_1, window_bounds = array<i64: 128, 256>}, {transform_indices = @transform_2, window_bounds = array<i64: 128, 128>}]} {
    %c0_i32 = arith.constant 0 : i32
    %0 = arith.cmpi eq, %arg1, %c0_i32 : i32
    %1 = arith.extui %0 : i1 to i32
    %c0_i32_0 = arith.constant 0 : i32
    %2 = arith.cmpi ne, %1, %c0_i32_0 : i32
    scf.if %2 {
      %cst_10 = arith.constant 0.000000e+00 : f32
      %12 = vector.broadcast %cst_10 : f32 to vector<128x128xf32>
      %c0_11 = arith.constant 0 : index
      %c0_12 = arith.constant 0 : index
      %13 = vector.load %arg4[%c0_11, %c0_12] : memref<128x128xf32, #tpu.memory_space<vmem>>, vector<128x128xf32>
      tpu.vector_store %arg4[%c0_11, %c0_12], %12 {strides = array<i32>} : memref<128x128xf32, #tpu.memory_space<vmem>>, vector<128x128xf32>,
    } else {
    }
    %c0 = arith.constant 0 : index
    %c0_1 = arith.constant 0 : index
    %3 = vector.load %arg4[%c0, %c0_1] : memref<128x128xf32, #tpu.memory_space<vmem>>, vector<128x128xf32>
    %c0_2 = arith.constant 0 : index
    %c0_3 = arith.constant 0 : index
    %4 = vector.load %arg2[%c0_2, %c0_3] : memref<128x256xbf16, #tpu.memory_space<vmem>>, vector<128x256xbf16>
    %c0_4 = arith.constant 0 : index
    %c0_5 = arith.constant 0 : index
    %5 = vector.load %arg3[%c0_4, %c0_5] : memref<128x256xbf16, #tpu.memory_space<vmem>>, vector<128x256xbf16>
    %cst = arith.constant dense<0.000000e+00> : vector<128x128xf32>
    %6 = tpu.matmul %4, %5, %cst {dimension_numbers = #tpu.dot_dimension_numbers<[1], [1], [0], [0], [0, 0, 1, 0], [], []>} : vector<128x256xbf16>, vector<128x256xbf16>, vector<128x128xf32> -> vector<128x128xf32>
    %7 = arith.addf %3, %6 : vector<128x128xf32>
    %c0_6 = arith.constant 0 : index
    %c0_7 = arith.constant 0 : index
    %8 = vector.load %arg4[%c0_6, %c0_7] : memref<128x128xf32, #tpu.memory_space<vmem>>, vector<128x128xf32>
    tpu.vector_store %arg4[%c0_6, %c0_7], %7 {strides = array<i32>} : memref<128x128xf32, #tpu.memory_space<vmem>>, vector<128x128xf32>,
    %c0_i32_8 = arith.constant 0 : i32
    %9 = arith.cmpi eq, %arg1, %c0_i32_8 : i32
    %10 = arith.extui %9 : i1 to i32
    %c0_i32_9 = arith.constant 0 : i32
    %11 = arith.cmpi ne, %10, %c0_i32_9 : i32
    scf.if %11 {
      %c0_10 = arith.constant 0 : index
      %c0_11 = arith.constant 0 : index
      %12 = vector.load %arg4[%c0_10, %c0_11] : memref<128x128xf32, #tpu.memory_space<vmem>>, vector<128x128xf32>
      %cst_12 = arith.constant 1.22070313E-4 : f32
      %13 = vector.broadcast %cst_12 : f32 to vector<128x128xf32>
      %14 = arith.mulf %12, %13 : vector<128x128xf32>
      %c0_13 = arith.constant 0 : index
      %c0_14 = arith.constant 0 : index
      %15 = vector.load %arg4[%c0_13, %c0_14] : memref<128x128xf32, #tpu.memory_space<vmem>>, vector<128x128xf32>
      tpu.vector_store %arg4[%c0_13, %c0_14], %14 {strides = array<i32>} : memref<128x128xf32, #tpu.memory_space<vmem>>, vector<128x128xf32>,
    } else {
    }
    return
  }
  func.func @transform_0(%arg0: i32, %arg1: i32) -> (i32, i32) {
    %c0_i32 = arith.constant 0 : i32
    return %arg0, %arg1 : i32, i32
  }
  func.func @transform_1(%arg0: i32, %arg1: i32) -> (i32, i32) {
    %c0_i32 = arith.constant 0 : i32
    %c0_i32_0 = arith.constant 0 : i32
    return %c0_i32, %arg1 : i32, i32
  }
  func.func @transform_2(%arg0: i32, %arg1: i32) -> (i32, i32) {
    %c0_i32 = arith.constant 0 : i32
    %c0_i32_0 = arith.constant 0 : i32
    return %arg0, %c0_i32 : i32, i32
  }
}

</mosaic_0001>

<bundles_post_ra>
// kernel: gram_matrix_padded.1
= control target key start
LH: loop header
LB: loop body
LE: loop exit
PB: predicated region body
PF: predicated region fallthrough
CT: control target
= control target key end

     0   :  { %s687_s0 = inlined_call_operand.vmem [shape: bf16[128,256], index: 0, kind: input, shape index: {}, may-alias: {0,1}]   ;;  %s688_s1 = inlined_call_operand.vmem [shape: bf16[128,256], index: 1, kind: input, shape index: {}, may-alias: {0,1}]   ;;  %s689_s2 = inlined_call_operand.hbm [shape: f32[128,128], index: 2, kind: output, shape index: {}]  }
   0x1   :  { %v489_v0 = vld [vmem:[%s688_s1 + $0x4] ss:$8 sps:$4 sm:$0xff]   ;;  %v491_v1 = vld [vmem:[%s688_s1] ss:$8 sps:$4 sm:$0xff]   ;;  %v492_v2 = vld [vmem:[%s688_s1 + $0x14] ss:$8 sps:$4 sm:$0xff]  }
   0x2   :  { %241 = vmatprep.subr.bf16.mxu0 %v489_v0  ;;  %469 = vmatprep.subr.bf16.mxu1 %v489_v0  ;;  %v494_v3 = vld [vmem:[%s688_s1 + $0x10] ss:$8 sps:$4 sm:$0xff]   ;;  %v495_v4 = vld [vmem:[%s688_s1 + $0x24] ss:$8 sps:$4 sm:$0xff]   ;;  %v497_v7 = vld [vmem:[%s688_s1 + $0x20] ss:$8 sps:$4 sm:$0xff]  }
   0x3   :  { %242 = vmatpush1.bf16.xpose.msra.mxu0 %v491_v1  ;;  %477 = vmatpush1.bf16.xpose.msra.mxu1 %v491_v1  ;;  %v515_v5 = vld [vmem:[%s687_s0 + $0x4] ss:$8 sps:$4 sm:$0xff]   ;;  %v498_v8 = vld [vmem:[%s688_s1 + $0x34] ss:$8 sps:$4 sm:$0xff]  }
   0x4   :  { %243 = vmatprep.subr.bf16.mxu0 %v492_v2  ;;  %470 = vmatprep.subr.bf16.mxu1 %v492_v2  ;;  %v518_v6 = vld [vmem:[%s687_s0 + $0x44] ss:$8 sps:$4 sm:$0xff]  }
   0x5   :  { %273 = vmatprep.mubr.bf16.mxu0 %v515_v5  ;;  %305 = vmatprep.mubr.bf16.mxu1 %v518_v6 }
   0xb   :  { %244 = vmatpush1.bf16.xpose.msra.mxu0 %v494_v3  ;;  %478 = vmatpush1.bf16.xpose.msra.mxu1 %v494_v3 }
   0xc   :  { %245 = vmatprep.subr.bf16.mxu0 %v495_v4  ;;  %471 = vmatprep.subr.bf16.mxu1 %v495_v4 }
  0x13   :  { %246 = vmatpush1.bf16.xpose.msra.mxu0 %v497_v7  ;;  %479 = vmatpush1.bf16.xpose.msra.mxu1 %v497_v7 }
  0x14   :  { %247 = vmatprep.subr.bf16.mxu0 %v498_v8  ;;  %472 = vmatprep.subr.bf16.mxu1 %v498_v8 }
  0x15   :  { %7 = vsyncpa [#allocation3], 0  ;;  %v500_v9 = vld [vmem:[%s688_s1 + $0x30] ss:$8 sps:$4 sm:$0xff]   ;;  %v501_v10 = vld [vmem:[%s688_s1 + $0x44] ss:$8 sps:$4 sm:$0xff]  }
  0x16   :  { %v503_v11 = vld [vmem:[%s688_s1 + $0x40] ss:$8 sps:$4 sm:$0xff]   ;;  %v504_v12 = vld [vmem:[%s688_s1 + $0x54] ss:$8 sps:$4 sm:$0xff]   ;;  %v506_v13 = vld [vmem:[%s688_s1 + $0x50] ss:$8 sps:$4 sm:$0xff]  }
  0x17   :  { %v507_v14 = vld [vmem:[%s688_s1 + $0x64] ss:$8 sps:$4 sm:$0xff]   ;;  %v509_v15 = vld [vmem:[%s688_s1 + $0x60] ss:$8 sps:$4 sm:$0xff]   ;;  %v510_v16 = vld [vmem:[%s688_s1 + $0x74] ss:$8 sps:$4 sm:$0xff]  }
  0x18   :  { %v512_v17 = vld [vmem:[%s688_s1 + $0x70] ss:$8 sps:$4 sm:$0xff]   ;;  %v513_v18 = vld [vmem:[%s687_s0] ss:$8 sps:$4 sm:$0xff]   ;;  %v519_v20 = vld [vmem:[%s687_s0 + $0x14] ss:$8 sps:$4 sm:$0xff]  }
  0x19   :  { %v516_v19 = vld [vmem:[%s687_s0 + $0x40] ss:$8 sps:$4 sm:$0xff]   ;;  %v521_v21 = vld [vmem:[%s687_s0 + $0x54] ss:$8 sps:$4 sm:$0xff]   ;;  %v523_v22 = vld [vmem:[%s687_s0 + $0x10] ss:$8 sps:$4 sm:$0xff]  }
  0x1a   :  { %v524_v23 = vld [vmem:[%s687_s0 + $0x50] ss:$8 sps:$4 sm:$0xff]   ;;  %v525_v24 = vld [vmem:[%s687_s0 + $0x24] ss:$8 sps:$4 sm:$0xff]   ;;  %v529_v26 = vld [vmem:[%s687_s0 + $0x20] ss:$8 sps:$4 sm:$0xff]  }
  0x1b   :  { %248 = vmatpush1.bf16.xpose.msra.mxu0 %v500_v9  ;;  %480 = vmatpush1.bf16.xpose.msra.mxu1 %v500_v9  ;;  %v527_v25 = vld [vmem:[%s687_s0 + $0x64] ss:$8 sps:$4 sm:$0xff]   ;;  %v530_v27 = vld [vmem:[%s687_s0 + $0x60] ss:$8 sps:$4 sm:$0xff]   ;;  %v531_v28 = vld [vmem:[%s687_s0 + $0x34] ss:$8 sps:$4 sm:$0xff]  }
  0x1c   :  { %249 = vmatprep.subr.bf16.mxu0 %v501_v10  ;;  %473 = vmatprep.subr.bf16.mxu1 %v501_v10  ;;  %v533_v29 = vld [vmem:[%s687_s0 + $0x74] ss:$8 sps:$4 sm:$0xff]   ;;  %v535_v30 = vld [vmem:[%s687_s0 + $0x30] ss:$8 sps:$4 sm:$0xff]  }
  0x1d   :  { %v536_v31 = vld [vmem:[%s687_s0 + $0x70] ss:$8 sps:$4 sm:$0xff]   ;;  %s561_s0 = smov [#allocation2]  }
  0x1e   :  { %s426_s16 = sshll.u32 %s561_s0, 4  ;;  %s427_s16 = int_to_ptr.vmem [resolvable:$true] %s426_s16 }
  0x1f   :  { %s537_s17 = scalar_lea.vmem %s427_s16, 2048  ;;  %p542_p1 = scmp.lt.s32.totalorder %s427_s16, %s427_s16 }
  0x20   :  { %p538_p0 = scmp.ne.s32.totalorder %s427_s16, %s537_s17  ;;  %p543_p2 = scmp.lt.s32.totalorder %s537_s17, %s537_s17 }
  0x22   :  { %p544_p3 = por %p543_p2, %p542_p1 }
  0x23   :  { %250 = vmatpush1.bf16.xpose.msra.mxu0 %v503_v11  ;;  %481 = vmatpush1.bf16.xpose.msra.mxu1 %v503_v11 }
  0x24   :  { %251 = vmatprep.subr.bf16.mxu0 %v504_v12  ;;  %474 = vmatprep.subr.bf16.mxu1 %v504_v12  ;;  %p545_p4 = pnand %p544_p3, %p538_p0 }
  0x2b   :  { %252 = vmatpush1.bf16.xpose.msra.mxu0 %v506_v13  ;;  %482 = vmatpush1.bf16.xpose.msra.mxu1 %v506_v13 }
  0x2c   :  { %253 = vmatprep.subr.bf16.mxu0 %v507_v14  ;;  %475 = vmatprep.subr.bf16.mxu1 %v507_v14 }
  0x33   :  { %254 = vmatpush1.bf16.xpose.msra.mxu0 %v509_v15  ;;  %483 = vmatpush1.bf16.xpose.msra.mxu1 %v509_v15 }
  0x34   :  { %255 = vmatprep.subr.bf16.mxu0 %v510_v16  ;;  %476 = vmatprep.subr.bf16.mxu1 %v510_v16 }
  0x3b   :  { %256 = vmatpush1.bf16.xpose.msra.mxu0 %v512_v17  ;;  %484 = vmatpush1.bf16.xpose.msra.mxu1 %v512_v17 }
  0x42   :  { %274 = vmatmul.mubr.bf16.vlgmr.msra.gmra.mrb[0].mxu0 %v513_v18  ;;  %306 = vmatmul.mubr.bf16.vlgmr.msra.gmra.mrb[0].mxu1 %v516_v19 }
  0x43   :  { %281 = vmatprep.mubr.bf16.mxu0 %v519_v20  ;;  %313 = vmatprep.mubr.bf16.mxu1 %v521_v21 }
  0x4a   :  { %282 = vmatmul.mubr.bf16.gmra.mrb[4].mxu0 %v523_v22  ;;  %314 = vmatmul.mubr.bf16.gmra.mrb[4].mxu1 %v524_v23 }
  0x4b   :  { %289 = vmatprep.mubr.bf16.mxu0 %v525_v24  ;;  %321 = vmatprep.mubr.bf16.mxu1 %v527_v25 }
  0x52   :  { %290 = vmatmul.mubr.bf16.gmra.mrb[8].mxu0 %v529_v26  ;;  %322 = vmatmul.mubr.bf16.gmra.mrb[8].mxu1 %v530_v27 }
  0x53   :  { %297 = vmatprep.mubr.bf16.mxu0 %v531_v28  ;;  %329 = vmatprep.mubr.bf16.mxu1 %v533_v29 }
  0x5a   :  { %298 = vmatmul.mubr.bf16.gmra.mrb[12].mxu0 %v535_v30  ;;  %330 = vmatmul.mubr.bf16.gmra.mrb[12].mxu1 %v536_v31 }
 0x115   :  { %v275_v32 = vpop.f32.mrb[0].mxu0  ;;  %v307_v33 = vpop.f32.mrb[0].mxu1 }
 0x116   :  { %v277_v34 = vpop.f32.mrb[1].mxu0  ;;  %v309_v35 = vpop.f32.mrb[1].mxu1  ;;  %v389_v38 = vmul.f32 0.00012207031, %v275_v32  ;;  %v397_v39 = vmul.f32 0.00012207031, %v307_v33 }
 0x117   :  { %v278_v36 = vpop.f32.mrb[2].mxu0  ;;  %v310_v37 = vpop.f32.mrb[2].mxu1 }
 0x118   :  { %v280_v40 = vpop.f32.mrb[3].mxu0  ;;  %v312_v41 = vpop.f32.mrb[3].mxu1  ;;  %405 = vst [vmem:[#allocation2] sm:$0xff] %v389_v38  ;;  %413 = vst [vmem:[#allocation2 + $0x40] sm:$0xff] %v397_v39  ;;  %v390_v42 = vmul.f32 0.00012207031, %v278_v36  ;;  %v398_v43 = vmul.f32 0.00012207031, %v310_v37 }
 0x11a   :  { %406 = vst [vmem:[#allocation2 + $0x8] sm:$0xff] %v390_v42  ;;  %414 = vst [vmem:[#allocation2 + $0x48] sm:$0xff] %v398_v43 }
 0x11d   :  { %v283_v44 = vpop.f32.mrb[4].mxu0  ;;  %v315_v45 = vpop.f32.mrb[4].mxu1 }
 0x11e   :  { %v285_v46 = vpop.f32.mrb[5].mxu0  ;;  %v317_v47 = vpop.f32.mrb[5].mxu1  ;;  %v391_v50 = vmul.f32 0.00012207031, %v283_v44  ;;  %v399_v51 = vmul.f32 0.00012207031, %v315_v45 }
 0x11f   :  { %v286_v48 = vpop.f32.mrb[6].mxu0  ;;  %v318_v49 = vpop.f32.mrb[6].mxu1 }
 0x120   :  { %v288_v52 = vpop.f32.mrb[7].mxu0  ;;  %v320_v53 = vpop.f32.mrb[7].mxu1  ;;  %407 = vst [vmem:[#allocation2 + $0x10] sm:$0xff] %v391_v50  ;;  %415 = vst [vmem:[#allocation2 + $0x50] sm:$0xff] %v399_v51  ;;  %v392_v54 = vmul.f32 0.00012207031, %v286_v48  ;;  %v400_v55 = vmul.f32 0.00012207031, %v318_v49 }
 0x122   :  { %408 = vst [vmem:[#allocation2 + $0x18] sm:$0xff] %v392_v54  ;;  %416 = vst [vmem:[#allocation2 + $0x58] sm:$0xff] %v400_v55 }
 0x125   :  { %v291_v56 = vpop.f32.mrb[8].mxu0  ;;  %v323_v57 = vpop.f32.mrb[8].mxu1 }
 0x126   :  { %v293_v58 = vpop.f32.mrb[9].mxu0  ;;  %v325_v59 = vpop.f32.mrb[9].mxu1  ;;  %v393_v62 = vmul.f32 0.00012207031, %v291_v56  ;;  %v401_v63 = vmul.f32 0.00012207031, %v323_v57 }
 0x127   :  { %v294_v60 = vpop.f32.mrb[10].mxu0  ;;  %v326_v61 = vpop.f32.mrb[10].mxu1 }
 0x128   :  { %v296_v0 = vpop.f32.mrb[11].mxu0  ;;  %v328_v1 = vpop.f32.mrb[11].mxu1  ;;  %409 = vst [vmem:[#allocation2 + $0x20] sm:$0xff] %v393_v62  ;;  %417 = vst [vmem:[#allocation2 + $0x60] sm:$0xff] %v401_v63  ;;  %v394_v2 = vmul.f32 0.00012207031, %v294_v60  ;;  %v402_v3 = vmul.f32 0.00012207031, %v326_v61 }
 0x12a   :  { %410 = vst [vmem:[#allocation2 + $0x28] sm:$0xff] %v394_v2  ;;  %418 = vst [vmem:[#allocation2 + $0x68] sm:$0xff] %v402_v3 }
 0x12d   :  { %v299_v4 = vpop.f32.mrb[12].mxu0  ;;  %v331_v5 = vpop.f32.mrb[12].mxu1 }
 0x12e   :  { %v301_v6 = vpop.f32.mrb[13].mxu0  ;;  %v333_v7 = vpop.f32.mrb[13].mxu1  ;;  %v395_v10 = vmul.f32 0.00012207031, %v299_v4  ;;  %v403_v11 = vmul.f32 0.00012207031, %v331_v5 }
 0x12f   :  { %v302_v8 = vpop.f32.mrb[14].mxu0  ;;  %v334_v9 = vpop.f32.mrb[14].mxu1 }
 0x130   :  { %v304_v12 = vpop.f32.mrb[15].mxu0  ;;  %v336_v13 = vpop.f32.mrb[15].mxu1  ;;  %411 = vst [vmem:[#allocation2 + $0x30] sm:$0xff] %v395_v10  ;;  %419 = vst [vmem:[#allocation2 + $0x70] sm:$0xff] %v403_v11  ;;  %v396_v14 = vmul.f32 0.00012207031, %v302_v8  ;;  %v404_v15 = vmul.f32 0.00012207031, %v334_v9 }
 0x132   :  { %412 = vst [vmem:[#allocation2 + $0x38] sm:$0xff] %v396_v14  ;;  %420 = vst [vmem:[#allocation2 + $0x78] sm:$0xff] %v404_v15 }
 0x133   :  { %548 = shalt.err (!%p545_p4)
}
 0x134   :  { %s549_s20 = scalar_lea.hbm %s689_s2, 2048 }
 0x135   :  { %p550_p5 = scmp.ne.s32.totalorder %s689_s2, %s549_s20  ;;  %p553_p6 = scmp.lt.u32.totalorder %s549_s20, %s689_s2 }
 0x137   :  { %p555_p7 = pnand %p553_p6, %p550_p5 }
 0x139   :  { %558 = shalt.err (!%p555_p7)
}
 0x13a   :  { %s562_s1 = smov 128   ;;  %s563_s25 = smov 8  }
 0x13b   :  { %432 = dma.vmem_to_hbm [thread:$0]  %s427_s16, 2048, %s689_s2, [#allocation3], %s562_s1, %s562_s1, %s563_s25  }
 0x13c   :  { %559 = dma.done.wait [#allocation3], 2048  }
 0x13d   :  { %560 = vsyncadd [#allocation3], 4294965248 }
 0x13e   :  { %436 = vsyncpa [#allocation3], 1 }

</bundles_post_ra>
